<compile_context>
chip_gen: v7x
topology: tpu7x:2x2x1
jax: 0.10.0
libtpu: 0.0.40
codegen_flags: <defaults>
</compile_context>

<pallas_src>
import jax
import jax.numpy as jnp
from jax.experimental import pallas as pl
from jax.experimental.pallas import tpu as pltpu


# ----------------------------------------------------------------- kernels

def gin_layer_kernel(a_ref, x_ref, wa_ref, ba_ref, wb_ref, bb_ref,
                     h_ref, acc_ref):
    """One GINConv layer (+ outer ReLU) for a (TM, C) tile of nodes.

    grid = (row_tiles, col_tiles); col axis is the reduction of A_hat @ x,
    where A_hat = A + (1+eps)*I was folded on the host (eps = 0).
    """
    k = pl.program_id(1)

    @pl.when(k == 0)
    def _():
        acc_ref[...] = jnp.zeros_like(acc_ref)

    # Aggregation: bf16 operands, f32 accumulation on the MXU.
    acc_ref[...] += jnp.dot(a_ref[...], x_ref[...],
                            preferred_element_type=jnp.float32)

    @pl.when(k == pl.num_programs(1) - 1)
    def _():
        agg = acc_ref[...].astype(jnp.bfloat16)
        z = jnp.dot(agg, wa_ref[...],
                    preferred_element_type=jnp.float32) + ba_ref[...]
        z = jnp.maximum(z, 0.0).astype(jnp.bfloat16)
        z = jnp.dot(z, wb_ref[...],
                    preferred_element_type=jnp.float32) + bb_ref[...]
        z = jnp.maximum(z, 0.0)                  # outer F.relu(conv(...))
        # F.dropout(training=False) is identity -> nothing to do.
        h_ref[...] = z.astype(h_ref.dtype)


def pool_fc_kernel(h_ref, p_ref, wfc_ref, bfc_ref, y_ref, acc_ref):
    """global_mean_pool + fc reordered as  P @ (h @ Wfc) + b.

    grid = (row_tiles,): a pure reduction over node tiles into a small
    lane-dense (G_pad, 128) accumulator.
    """
    k = pl.program_id(0)

    @pl.when(k == 0)
    def _():
        acc_ref[...] = jnp.zeros_like(acc_ref)

    t = jnp.dot(h_ref[...], wfc_ref[...],
                preferred_element_type=jnp.float32)              # (TM, 128)
    acc_ref[...] += jnp.dot(p_ref[...], t,
                            preferred_element_type=jnp.float32)  # (Gp, 128)

    @pl.when(k == pl.num_programs(0) - 1)
    def _():
        y_ref[...] = (acc_ref[...] + bfc_ref[...]).astype(y_ref.dtype)


# ----------------------------------------------------------------- wrappers

def gin_layer(a_hat, x, wa, ba, wb, bb, *, tm=128, tk=128):
    """h = relu(mlp(A_hat @ x)) with tiled aggregation. All feature dims padded to 128."""
    n = a_hat.shape[0]
    c_in = x.shape[1]
    c_hid = wa.shape[1]
    c_out = wb.shape[1]
    grid = (n // tm, n // tk)

    flops = int(2 * n * n * c_in + 2 * n * c_in * c_hid + 2 * n * c_hid * c_out)
    bytes_accessed = int(
        a_hat.size * a_hat.dtype.itemsize + x.size * x.dtype.itemsize +
        wa.size * 2 + wb.size * 2 + ba.size * 4 + bb.size * 4 + n * c_out * 2)

    return pl.pallas_call(
        gin_layer_kernel,
        out_shape=jax.ShapeDtypeStruct((n, c_out), jnp.bfloat16),
        grid_spec=pltpu.PrefetchScalarGridSpec(
            num_scalar_prefetch=0,
            grid=grid,
            in_specs=[
                pl.BlockSpec((tm, tk), lambda i, k: (i, k)),       # A_hat tile
                pl.BlockSpec((tk, c_in), lambda i, k: (k, 0)),     # x tile
                pl.BlockSpec((c_in, c_hid), lambda i, k: (0, 0)),  # Wa
                pl.BlockSpec((1, c_hid), lambda i, k: (0, 0)),     # ba
                pl.BlockSpec((c_hid, c_out), lambda i, k: (0, 0)), # Wb
                pl.BlockSpec((1, c_out), lambda i, k: (0, 0)),     # bb
            ],
            out_specs=pl.BlockSpec((tm, c_out), lambda i, k: (i, 0)),
            scratch_shapes=[pltpu.VMEM((tm, c_in), jnp.float32)],
        ),
        compiler_params=pltpu.CompilerParams(
            dimension_semantics=("parallel", "arbitrary"),
            vmem_limit_bytes=32 * 1024 * 1024,
        ),
        cost_estimate=pl.CostEstimate(flops=flops, transcendentals=0,
                                      bytes_accessed=bytes_accessed),
    )(a_hat, x, wa, ba, wb, bb)


def pool_fc(h, p, wfc, bfc, *, tm=128):
    """y = P @ (h @ Wfc) + b, reduced over node tiles. Output lane-dense (G_pad, 128)."""
    n, c = h.shape
    gp = p.shape[0]
    co = wfc.shape[1]
    grid = (n // tm,)

    flops = int(2 * n * c * co + 2 * gp * n * co)
    bytes_accessed = int(h.size * 2 + p.size * 4 + wfc.size * 2 +
                         bfc.size * 4 + gp * co * 4)

    return pl.pallas_call(
        pool_fc_kernel,
        out_shape=jax.ShapeDtypeStruct((gp, co), jnp.float32),
        grid_spec=pltpu.PrefetchScalarGridSpec(
            num_scalar_prefetch=0,
            grid=grid,
            in_specs=[
                pl.BlockSpec((tm, c), lambda k: (k, 0)),    # h tile
                pl.BlockSpec((gp, tm), lambda k: (0, k)),   # P tile
                pl.BlockSpec((c, co), lambda k: (0, 0)),    # Wfc
                pl.BlockSpec((1, co), lambda k: (0, 0)),    # bfc
            ],
            out_specs=pl.BlockSpec((gp, co), lambda k: (0, 0)),
            scratch_shapes=[pltpu.VMEM((gp, co), jnp.float32)],
        ),
        compiler_params=pltpu.CompilerParams(
            dimension_semantics=("arbitrary",),
            vmem_limit_bytes=32 * 1024 * 1024,
        ),
        cost_estimate=pl.CostEstimate(flops=flops, transcendentals=0,
                                      bytes_accessed=bytes_accessed),
    )(h, p, wfc, bfc)


def gin_forward(x_p, a_hat_p, p_pool_p, params_p, *, tm=128, tk=128):
    (w1a, b1a, w1b, b1b, w2a, b2a, w2b, b2b, wfc, bfc) = params_p
    h1 = gin_layer(a_hat_p, x_p, w1a, b1a, w1b, b1b, tm=tm, tk=tk)
    h2 = gin_layer(a_hat_p, h1, w2a, b2a, w2b, b2b, tm=tm, tk=tk)
    return pool_fc(h2, p_pool_p, wfc, bfc, tm=tm)


# ----------------------------------------------------------------- host-side setup

def make_params(key, in_channels, hidden):
    """Deterministic synthetic weights. Linear weights stored as (in, out)."""
    ks = jax.random.split(key, 10)
    scale = 0.1
    w1a = scale * jax.random.normal(ks[0], (in_channels, hidden), jnp.float32)
    b1a = scale * jax.random.normal(ks[1], (1, hidden), jnp.float32)
    w1b = scale * jax.random.normal(ks[2], (hidden, hidden), jnp.float32)
    b1b = scale * jax.random.normal(ks[3], (1, hidden), jnp.float32)
    w2a = scale * jax.random.normal(ks[4], (hidden, hidden), jnp.float32)
    b2a = scale * jax.random.normal(ks[5], (1, hidden), jnp.float32)
    w2b = scale * jax.random.normal(ks[6], (hidden, hidden), jnp.float32)
    b2b = scale * jax.random.normal(ks[7], (1, hidden), jnp.float32)
    wfc = scale * jax.random.normal(ks[8], (hidden, 1), jnp.float32)
    bfc = scale * jax.random.normal(ks[9], (1, 1), jnp.float32)
    return (w1a, b1a, w1b, b1b, w2a, b2a, w2b, b2b, wfc, bfc)


def build_graph(num_nodes, num_graphs):
    """Two ring graphs (bidirectional edges), nodes split evenly across graphs.
    Returns dense adjacency A (N,N) and mean-pool matrix P (G,N), both f32."""
    per = num_nodes // num_graphs
    src, dst = [], []
    for g in range(num_graphs):
        base = g * per
        for i in range(per):
            a = base + i
            b = base + (i + 1) % per
            src += [a, b]
            dst += [b, a]
    edge_index = jnp.array([src, dst], dtype=jnp.int32)   # (2, E): [source, target]
    batch = jnp.repeat(jnp.arange(num_graphs, dtype=jnp.int32), per)

    # A[target, source] = 1  ->  (A @ x)[i] = sum over incoming neighbors of i.
    A = jnp.zeros((num_nodes, num_nodes), jnp.float32)
    A = A.at[edge_index[1], edge_index[0]].add(1.0)

    # Mean-pool matrix: P[g, i] = 1/|graph g| if batch[i] == g else 0.
    onehot = (batch[None, :] == jnp.arange(num_graphs)[:, None]).astype(jnp.float32)
    counts = jnp.maximum(onehot.sum(axis=1, keepdims=True), 1.0)
    P = onehot / counts
    return A, P


def prepare_inputs(x, A, P, params, *, n_pad, c_pad=128, g_pad=8):
    """Pad to TPU-friendly shapes, fold (1+eps)*I into A, cast to bf16.

    Zero-padded nodes/features never contaminate real outputs: padded A_hat
    columns are zero (nothing flows into real rows) and padded P columns are
    zero (padded rows never pooled)."""
    N, c_in = x.shape
    G = P.shape[0]
    H = params[0].shape[1]

    a_hat = jnp.zeros((n_pad, n_pad), jnp.float32).at[:N, :N].set(A)
    a_hat = (a_hat + jnp.eye(n_pad, dtype=jnp.float32)).astype(jnp.bfloat16)  # eps = 0

    x_p = jnp.zeros((n_pad, c_pad), jnp.float32).at[:N, :c_in].set(x)
    x_p = x_p.astype(jnp.bfloat16)

    p_p = jnp.zeros((g_pad, n_pad), jnp.float32).at[:G, :N].set(P)

    def pad2(w, r, c):
        return jnp.zeros((r, c), jnp.float32).at[:w.shape[0], :w.shape[1]].set(w)

    (w1a, b1a, w1b, b1b, w2a, b2a, w2b, b2b, wfc, bfc) = params
    pw = lambda w: pad2(w, c_pad, c_pad).astype(jnp.bfloat16)   # bf16 weights
    pb = lambda b: pad2(b, 1, c_pad)                            # f32 biases
    params_p = (
        pw(w1a), pb(b1a), pw(w1b), pb(b1b),
        pw(w2a), pb(b2a), pw(w2b), pb(b2b),
        pad2(wfc, c_pad, 128).astype(jnp.bfloat16), pad2(bfc, 1, 128),
    )
    return x_p, a_hat, p_p, params_p


def reference_forward(x, A, P, params):
    """Plain-JAX f32 reference."""
    (w1a, b1a, w1b, b1b, w2a, b2a, w2b, b2b, wfc, bfc) = params
    agg = A @ x + x
    h = jnp.maximum(agg @ w1a + b1a, 0.0) @ w1b + b1b
    h = jnp.maximum(h, 0.0)
    agg2 = A @ h + h
    h2 = jnp.maximum(agg2 @ w2a + b2a, 0.0) @ w2b + b2b
    h2 = jnp.maximum(h2, 0.0)
    pooled = P @ h2
    return pooled @ wfc + bfc


if __name__ == "__main__":
    # Small shapes consistent with the module's forward:
    #   N = 16 nodes, in_channels = 4, hidden_channels = 32, 2 graphs in the batch.
    N, C_IN, HIDDEN, G = 16, 4, 32, 2
    TM = TK = 128
    N_PAD = 256        # 2 tiles per axis -> exercises the k-reduction/accumulator path
    C_PAD = 128        # feature lanes padded to 128 (lane-dense intermediates)
    G_PAD = 8          # sublane-aligned, lane-dense (G_PAD, 128) final store

    key = jax.random.PRNGKey(0)
    kx, kp = jax.random.split(key)
    x = jax.random.normal(kx, (N, C_IN), jnp.float32)          # data.x
    A, P = build_graph(N, G)                                    # from edge_index / batch
    params = make_params(kp, C_IN, HIDDEN)

    x_p, a_hat_p, p_p, params_p = prepare_inputs(
        x, A, P, params, n_pad=N_PAD, c_pad=C_PAD, g_pad=G_PAD)

    y_full = gin_forward(x_p, a_hat_p, p_p, params_p, tm=TM, tk=TK)
    y_full = jax.block_until_ready(y_full)
    out = y_full[:G, :1]                                        # un-pad

    ref = reference_forward(x, A, P, params)
    assert out.shape == (G, 1)
    assert jnp.allclose(out, ref, atol=2e-2, rtol=2e-2), (out, ref)

    print("KERNEL_OK")
</pallas_src>

<mosaic_0001>
module attributes {stable_mosaic.version = 11 : i64} {
  func.func @gin_layer_kernel(%arg0: i32, %arg1: i32, %arg2: memref<128x128xbf16, #tpu.memory_space<vmem>>, %arg3: memref<128x128xbf16, #tpu.memory_space<vmem>>, %arg4: memref<128x128xbf16, #tpu.memory_space<vmem>>, %arg5: memref<1x128xf32, #tpu.memory_space<vmem>>, %arg6: memref<128x128xbf16, #tpu.memory_space<vmem>>, %arg7: memref<1x128xf32, #tpu.memory_space<vmem>>, %arg8: memref<128x128xbf16, #tpu.memory_space<vmem>>, %arg9: memref<128x128xf32, #tpu.memory_space<vmem>>) attributes {dimension_semantics = [#tpu.dimension_semantics<parallel>, #tpu.dimension_semantics<arbitrary>], iteration_bounds = array<i64: 2, 2>, scalar_prefetch = 0 : i64, scratch_operands = 1 : i64, tpu.core_type = #tpu.core_type<tc>, window_params = [{transform_indices = @transform_0, window_bounds = array<i64: 128, 128>}, {transform_indices = @transform_1, window_bounds = array<i64: 128, 128>}, {pipeline_mode = #tpu.pipeline_mode<synchronous>, transform_indices = @transform_2, window_bounds = array<i64: 128, 128>}, {pipeline_mode = #tpu.pipeline_mode<synchronous>, transform_indices = @transform_3, window_bounds = array<i64: 1, 128>}, {pipeline_mode = #tpu.pipeline_mode<synchronous>, transform_indices = @transform_4, window_bounds = array<i64: 128, 128>}, {pipeline_mode = #tpu.pipeline_mode<synchronous>, transform_indices = @transform_5, window_bounds = array<i64: 1, 128>}, {transform_indices = @transform_6, window_bounds = array<i64: 128, 128>}]} {
    %c0_i32 = arith.constant 0 : i32
    %0 = arith.cmpi eq, %arg1, %c0_i32 : i32
    %1 = arith.extui %0 : i1 to i32
    %c0_i32_0 = arith.constant 0 : i32
    %2 = arith.cmpi ne, %1, %c0_i32_0 : i32
    scf.if %2 {
      %cst_9 = arith.constant 0.000000e+00 : f32
      %12 = vector.broadcast %cst_9 : f32 to vector<128x128xf32>
      %c0_10 = arith.constant 0 : index
      %c0_11 = arith.constant 0 : index
      %13 = vector.load %arg9[%c0_10, %c0_11] : memref<128x128xf32, #tpu.memory_space<vmem>>, vector<128x128xf32>
      tpu.vector_store %arg9[%c0_10, %c0_11], %12 {strides = array<i32>} : memref<128x128xf32, #tpu.memory_space<vmem>>, vector<128x128xf32>,
    } else {
    }
    %c0 = arith.constant 0 : index
    %c0_1 = arith.constant 0 : index
    %3 = vector.load %arg9[%c0, %c0_1] : memref<128x128xf32, #tpu.memory_space<vmem>>, vector<128x128xf32>
    %c0_2 = arith.constant 0 : index
    %c0_3 = arith.constant 0 : index
    %4 = vector.load %arg2[%c0_2, %c0_3] : memref<128x128xbf16, #tpu.memory_space<vmem>>, vector<128x128xbf16>
    %c0_4 = arith.constant 0 : index
    %c0_5 = arith.constant 0 : index
    %5 = vector.load %arg3[%c0_4, %c0_5] : memref<128x128xbf16, #tpu.memory_space<vmem>>, vector<128x128xbf16>
    %cst = arith.constant dense<0.000000e+00> : vector<128x128xf32>
    %6 = tpu.matmul %4, %5, %cst {dimension_numbers = #tpu.dot_dimension_numbers<[1], [0], [0], [1], [0, 0, 1, 1], [], []>} : vector<128x128xbf16>, vector<128x128xbf16>, vector<128x128xf32> -> vector<128x128xf32>
    %7 = arith.addf %3, %6 : vector<128x128xf32>
    %c0_6 = arith.constant 0 : index
    %c0_7 = arith.constant 0 : index
    %8 = vector.load %arg9[%c0_6, %c0_7] : memref<128x128xf32, #tpu.memory_space<vmem>>, vector<128x128xf32>
    tpu.vector_store %arg9[%c0_6, %c0_7], %7 {strides = array<i32>} : memref<128x128xf32, #tpu.memory_space<vmem>>, vector<128x128xf32>,
    %c1_i32 = arith.constant 1 : i32
    %9 = arith.cmpi eq, %arg1, %c1_i32 : i32
    %10 = arith.extui %9 : i1 to i32
    %c0_i32_8 = arith.constant 0 : i32
    %11 = arith.cmpi ne, %10, %c0_i32_8 : i32
    scf.if %11 {
      %c0_9 = arith.constant 0 : index
      %c0_10 = arith.constant 0 : index
      %12 = vector.load %arg9[%c0_9, %c0_10] : memref<128x128xf32, #tpu.memory_space<vmem>>, vector<128x128xf32>
      %13 = arith.truncf %12 : vector<128x128xf32> to vector<128x128xbf16>
      %c0_11 = arith.constant 0 : index
      %c0_12 = arith.constant 0 : index
      %14 = vector.load %arg4[%c0_11, %c0_12] : memref<128x128xbf16, #tpu.memory_space<vmem>>, vector<128x128xbf16>
      %cst_13 = arith.constant dense<0.000000e+00> : vector<128x128xf32>
      %15 = tpu.matmul %13, %14, %cst_13 {dimension_numbers = #tpu.dot_dimension_numbers<[1], [0], [0], [1], [0, 0, 1, 1], [], []>} : vector<128x128xbf16>, vector<128x128xbf16>, vector<128x128xf32> -> vector<128x128xf32>
      %c0_14 = arith.constant 0 : index
      %c0_15 = arith.constant 0 : index
      %16 = vector.load %arg5[%c0_14, %c0_15] : memref<1x128xf32, #tpu.memory_space<vmem>>, vector<1x128xf32>
      %17 = vector.broadcast %16 : vector<1x128xf32> to vector<128x128xf32>
      %18 = arith.addf %15, %17 : vector<128x128xf32>
      %cst_16 = arith.constant 0.000000e+00 : f32
      %19 = vector.broadcast %cst_16 : f32 to vector<128x128xf32>
      %20 = arith.maximumf %18, %19 : vector<128x128xf32>
      %21 = arith.truncf %20 : vector<128x128xf32> to vector<128x128xbf16>
      %c0_17 = arith.constant 0 : index
      %c0_18 = arith.constant 0 : index
      %22 = vector.load %arg6[%c0_17, %c0_18] : memref<128x128xbf16, #tpu.memory_space<vmem>>, vector<128x128xbf16>
      %cst_19 = arith.constant dense<0.000000e+00> : vector<128x128xf32>
      %23 = tpu.matmul %21, %22, %cst_19 {dimension_numbers = #tpu.dot_dimension_numbers<[1], [0], [0], [1], [0, 0, 1, 1], [], []>} : vector<128x128xbf16>, vector<128x128xbf16>, vector<128x128xf32> -> vector<128x128xf32>
      %c0_20 = arith.constant 0 : index
      %c0_21 = arith.constant 0 : index
      %24 = vector.load %arg7[%c0_20, %c0_21] : memref<1x128xf32, #tpu.memory_space<vmem>>, vector<1x128xf32>
      %25 = vector.broadcast %24 : vector<1x128xf32> to vector<128x128xf32>
      %26 = arith.addf %23, %25 : vector<128x128xf32>
      %cst_22 = arith.constant 0.000000e+00 : f32
      %27 = vector.broadcast %cst_22 : f32 to vector<128x128xf32>
      %28 = arith.maximumf %26, %27 : vector<128x128xf32>
      %29 = arith.truncf %28 : vector<128x128xf32> to vector<128x128xbf16>
      %c0_23 = arith.constant 0 : index
      %c0_24 = arith.constant 0 : index
      %30 = vector.load %arg8[%c0_23, %c0_24] : memref<128x128xbf16, #tpu.memory_space<vmem>>, vector<128x128xbf16>
      tpu.vector_store %arg8[%c0_23, %c0_24], %29 {strides = array<i32>} : memref<128x128xbf16, #tpu.memory_space<vmem>>, vector<128x128xbf16>,
    } else {
    }
    return
  }
  func.func @transform_0(%arg0: i32, %arg1: i32) -> (i32, i32) {
    %c0_i32 = arith.constant 0 : i32
    return %arg0, %arg1 : i32, i32
  }
  func.func @transform_1(%arg0: i32, %arg1: i32) -> (i32, i32) {
    %c0_i32 = arith.constant 0 : i32
    %c0_i32_0 = arith.constant 0 : i32
    return %arg1, %c0_i32 : i32, i32
  }
  func.func @transform_2(%arg0: i32, %arg1: i32) -> (i32, i32) {
    %c0_i32 = arith.constant 0 : i32
    %c0_i32_0 = arith.constant 0 : i32
    %c0_i32_1 = arith.constant 0 : i32
    return %c0_i32, %c0_i32_0 : i32, i32
  }
  func.func @transform_3(%arg0: i32, %arg1: i32) -> (i32, i32) {
    %c0_i32 = arith.constant 0 : i32
    %c0_i32_0 = arith.constant 0 : i32
    %c0_i32_1 = arith.constant 0 : i32
    return %c0_i32, %c0_i32_0 : i32, i32
  }
  func.func @transform_4(%arg0: i32, %arg1: i32) -> (i32, i32) {
    %c0_i32 = arith.constant 0 : i32
    %c0_i32_0 = arith.constant 0 : i32
    %c0_i32_1 = arith.constant 0 : i32
    return %c0_i32, %c0_i32_0 : i32, i32
  }
  func.func @transform_5(%arg0: i32, %arg1: i32) -> (i32, i32) {
    %c0_i32 = arith.constant 0 : i32
    %c0_i32_0 = arith.constant 0 : i32
    %c0_i32_1 = arith.constant 0 : i32
    return %c0_i32, %c0_i32_0 : i32, i32
  }
  func.func @transform_6(%arg0: i32, %arg1: i32) -> (i32, i32) {
    %c0_i32 = arith.constant 0 : i32
    %c0_i32_0 = arith.constant 0 : i32
    return %arg0, %c0_i32 : i32, i32
  }
}

</mosaic_0001>

<bundles_post_ra>
// kernel: tpu_custom_call.1
= control target key start
LH: loop header
LB: loop body
LE: loop exit
PB: predicated region body
PF: predicated region fallthrough
CT: control target
= control target key end

     0   :  { %s2548_s0 = inlined_call_operand.hbm [shape: bf16[256,256], index: 0, kind: input, shape index: {}]   ;;  %s2549_s1 = inlined_call_operand.hbm [shape: bf16[256,128], index: 1, kind: input, shape index: {}]   ;;  %s2550_s2 = inlined_call_operand.hbm [shape: bf16[128,128], index: 2, kind: input, shape index: {}]   ;;  %s2551_s3 = inlined_call_operand.vmem [shape: f32[1,128], index: 3, kind: input, shape index: {}]   ;;  %s2552_s4 = inlined_call_operand.hbm [shape: bf16[128,128], index: 4, kind: input, shape index: {}]   ;;  %s2553_s5 = inlined_call_operand.vmem [shape: f32[1,128], index: 5, kind: input, shape index: {}]   ;;  %s2554_s6 = inlined_call_operand.hbm [shape: bf16[256,128], index: 6, kind: output, shape index: {}]  }
   0x1   :  { %2578 = sst [smem:[#allocation26_spill]] %s2550_s2 }
   0x2   :  { %2579 = sst [smem:[#allocation27_spill]] %s2551_s3 }
   0x3   :  { %2580 = sst [smem:[#allocation28_spill]] %s2552_s4 }
   0x4   :  { %2581 = sst [smem:[#allocation29_spill]] %s2553_s5 }
   0x5   :  { %2582 = sst [smem:[#allocation30_spill]] %s2554_s6 }
   0x6   :  { %11 = vsyncpa [#allocation4], 0 }
   0x7   :  { %13 = vsyncpa [#allocation4 + $0x1], 0 }
   0x8   :  { %14 = vsyncpa [#allocation7], 0 }
   0x9   :  { %16 = vsyncpa [#allocation7 + $0x1], 0 }
   0xa   :  { %17 = vsyncpa [#allocation10], 0 }
   0xb   :  { %18 = vsyncpa [#allocation5], 0 }
   0xc   :  { %20 = vsyncpa [#allocation5 + $0x1], 0  ;;  %s2092_s21 = smov 0   ;;  %s2094_s22 = smov 0  }
   0xd   :  { %s2096_s23 = smov 0   ;;  %s2098_s24 = smov 0  }
   0xe   :  { %s2100_s25 = smov 0   ;;  %s2102_s26 = smov 0  }
   0xf   :  { %s2104_s27 = smov 0   ;;  %s2106_s28 = smov 0  }
  0x10   :  { %s2108_s29 = smov 0   ;;  %s2110_s30 = smov 0  }
  0x11   :  { %s2112_s7 = smov 0   ;;  %s2114_s8 = smov 0  }
  0x12   :  { %s2116_s9 = smov 0   ;;  %s2118_s10 = smov 0  }
  0x13 LB: > { %2583 = sst [smem:[#allocation17_spill]] %s1992_s21  ;;  %s2159_s11 = sadd.s32 4294967295, %s2044_s10   ;;  %s2044_s10 = sphi %s2118_s10, %s26_s10   ;;  %s2040_s9 = sphi %s2116_s9, %s2647_s9   ;;  %s2036_s8 = sphi %s2114_s8, %s2646_s8   ;;  %s2032_s7 = sphi %s2112_s7, %s2645_s7   ;;  %s2028_s30 = sphi %s2110_s30, %s2644_s30   ;;  %s2024_s29 = sphi %s2108_s29, %s2643_s29   ;;  %s2020_s28 = sphi %s2106_s28, %s2642_s28   ;;  %s2016_s27 = sphi %s2104_s27, %s2641_s27   ;;  %s2012_s26 = sphi %s2102_s26, %s2640_s26   ;;  %s2008_s25 = sphi %s2100_s25, %s2639_s25   ;;  %s2004_s24 = sphi %s2098_s24, %s2638_s24   ;;  %s2000_s23 = sphi %s2096_s23, %s2637_s23   ;;  %s1996_s22 = sphi %s2094_s22, %s2636_s22   ;;  %s1992_s21 = sphi %s2092_s21, %s2635_s21  }
  0x14   : > { %2584 = sst [smem:[#allocation18_spill]] %s1996_s22  ;;  %s1279_s12 = sadd.s32 4294967294, %s2044_s10  }
  0x15   : > { %2585 = sst [smem:[#allocation19_spill]] %s2028_s30  ;;  %p60_p0 = scmp.ne.s32.totalorder %s2020_s28, %s2016_s27 }
  0x16   : > { %2586 = sst [smem:[#allocation20_spill]] %s2032_s7  ;;  %p2560_p1 = scmp.eq.s32.totalorder %s2159_s11, 0 }
  0x17   : > { %2587 = sst [smem:[#allocation21_spill]] %s2159_s11  ;;  %p86_p2 = scmp.ne.s32.totalorder %s2008_s25, %s2004_s24 }
  0x18   : > { %p2168_p3 = por %p2560_p1, %p60_p0  ;;  %p193_p4 = scmp.ne.s32.totalorder %s2000_s23, %s1996_s22 }
  0x19   : > { %p2176_p5 = por %p86_p2, %p2560_p1  ;;  %p194_p6 = scmp.eq.s32.totalorder %s2159_s11, 3 }
  0x1a   : > { %s2588_s14 = scalar_select %p2168_p3, 1, 0 }
  0x1b   : > { %s2589_s15 = scalar_select %p2176_p5, 1, 0 }
  0x1c   : > { %p199_p7 = scmp.ne.s32.totalorder %s1996_s22, %s1992_s21  ;;  %p200_p8 = scmp.eq.s32.totalorder %s1279_s12, 3 }
  0x1d   : > { %2590 = sst [smem:[#allocation22_spill]] %s2589_s15  ;;  %p2183_p9 = por %p194_p6, %p193_p4 }
  0x1e   : > { %p1280_p10 = scmp.ge.s32.totalorder %s2044_s10, 1  ;;  %p2188_p11 = por %p200_p8, %p199_p7 }
  0x1f   : > { %s2591_s16 = scalar_select %p2183_p9, 1, 0 }
  0x20   : > { %s2593_s17 = scalar_select %p2188_p11, 1, 0 }
  0x21   : > { %2592 = sst [smem:[#allocation23_spill]] %s2591_s16  ;;  %p207_p12 = scmp.lt.s32.totalorder %s2044_s10, 5 }
  0x22   : > { %2594 = sst [smem:[#allocation24_spill]] %s2593_s17  ;;  %s2046_s19 = smov [#allocation8]  }
  0x23   : > { %p2193_p13 = pnand %p1280_p10, %p207_p12  ;;  %s219_s20 = sshll.u32 %s2046_s19, 4  ;;  %s220_s20 = int_to_ptr.vmem [resolvable:$true] %s219_s20 }
  0x24   : > { %s2047_s27 = smov [#allocation9]   ;;  %s2597_s2 = sld [smem:[#allocation26_spill]] }
  0x25   : > { %s2595_s18 = scalar_select %p2193_p13, 1, 0 }
  0x26   : > { %p1594_p0 = pneg %p2193_p13  ;;  %s235_s12 = sshll.u32 %s2047_s27, 4  ;;  %s2205_s12 = int_to_ptr.vmem [resolvable:$true] %s235_s12 }
  0x28   : > { %p2201_p2 = pnand %p1594_p0, %p2560_p1 }
  0x2a   : > { %s1770_s21 = scalar_lea.hbm %s2597_s2, 1024  ;;  %p1772_p6 = pneg %p2201_p2 }
  0x2b   : > { %p1771_p4 = scmp.ne.s32.totalorder %s2597_s2, %s1770_s21  ;;  %p1777_p10 = scmp.lt.u32.totalorder %s1770_s21, %s2597_s2 }
  0x2d   : > { %p1773_p7 = pnand %p1772_p6, %p1771_p4 }
  0x2f   : > { %p1774_p8 = pneg %p1773_p7 }
  0x31   : > { %p1779_p12 = pnand %p1777_p10, %p1774_p8 }
  0x33   : > { %1782 = shalt.err (!%p1779_p12)
}
  0x34   : > { %s1783_s27 = scalar_lea.vmem %s220_s20, 1024  ;;  %p1791_p9 = scmp.lt.s32.totalorder %s220_s20, %s220_s20 }
  0x35   : > { %p1784_p0 = scmp.ne.s32.totalorder %s220_s20, %s1783_s27  ;;  %p1792_p5 = scmp.lt.s32.totalorder %s1783_s27, %s1783_s27 }
  0x37   : > { %p1786_p1 = pnand %p1784_p0, %p1772_p6  ;;  %p1793_p3 = por %p1792_p5, %p1791_p9 }
  0x39   : > { %p1787_p11 = pneg %p1786_p1 }
  0x3b   : > { %p1794_p13 = pnand %p1793_p3, %p1787_p11 }
  0x3d   : > { %1797 = shalt.err (!%p1794_p13)
}
  0x3e   : > { %s2565_s6 = smov 64   ;;  %s2567_s13 = smov 4  }
  0x3f   : > { %1597 = dma.hbm_to_vmem [thread:$0]  (!%p2201_p2), %s2597_s2, 1024, %s220_s20, [#allocation7], %s2565_s6, %s2565_s6, %s2567_s13  }
  0x40   : > { %s2598_s4 = sld [smem:[#allocation28_spill]] }
  0x46   : > { %s1798_s19 = scalar_lea.hbm %s2598_s4, 1024 }
  0x47   : > { %p1799_p1 = scmp.ne.s32.totalorder %s2598_s4, %s1798_s19  ;;  %p1805_p9 = scmp.lt.u32.totalorder %s1798_s19, %s2598_s4 }
  0x49   : > { %p1801_p3 = pnand %p1799_p1, %p1772_p6 }
  0x4b   : > { %p1802_p5 = pneg %p1801_p3 }
  0x4d   : > { %p1807_p11 = pnand %p1805_p9, %p1802_p5 }
  0x4f   : > { %1810 = shalt.err (!%p1807_p11)
}
  0x50   : > { %s1811_s20 = scalar_lea.vmem %s2205_s12, 1024  ;;  %p1819_p8 = scmp.lt.s32.totalorder %s2205_s12, %s2205_s12 }
  0x51   : > { %p1812_p13 = scmp.ne.s32.totalorder %s2205_s12, %s1811_s20  ;;  %p1820_p10 = scmp.lt.s32.totalorder %s1811_s20, %s1811_s20 }
  0x53   : > { %p1814_p4 = pnand %p1812_p13, %p1772_p6  ;;  %p1821_p12 = por %p1820_p10, %p1819_p8 }
  0x55   : > { %p1815_p7 = pneg %p1814_p4 }
  0x57   : > { %p1822_p0 = pnand %p1821_p12, %p1815_p7 }
  0x59   : > { %1825 = shalt.err (!%p1822_p0)
}
  0x5a   : > { %1600 = dma.hbm_to_vmem [thread:$0]  (!%p2201_p2), %s2598_s4, 1024, %s2205_s12, [#allocation10], %s2565_s6, %s2565_s6, %s2567_s13  }
  0x5b   : > { %s35_s30 = sadd.s32 1, %s2036_s8  ;;  %s38_s24 = sadd.s32 1, %s2040_s9 }
  0x5c   : > { %p36_p6 = scmp.ge.s32.totalorder %s35_s30, 2  ;;  %s47_s21 = sadd.s32 1, %s2024_s29 }
  0x5d   : > { %p54_p1 = scmp.ne.s32.totalorder %s2024_s29, %s2020_s28  ;;  %p2577_p3 = scmp.eq.s32.totalorder %s2044_s10, 0 }
  0x5e   : > { %s2649_s30 = smov (%p36_p6, %s35_s30), 0  ;;  %s2651_s24 = smov (!%p36_p6, %s38_s24), %s2040_s9 }
  0x5f   : > { %2599 = sst [smem:[#allocation25_spill]] %s2649_s30  ;;  %s2271_s7 = ssub.s32 %s2036_s8, %s2649_s30 }
  0x60   : > { %p2275_p2 = por %p2577_p3, %p54_p1  ;;  %p40_p5 = scmp.ge.s32.totalorder %s2651_s24, 2 }
  0x61   : > { %p71_p9 = scmp.eq.s32.totalorder %s2271_s7, 0  ;;  %p2576_p11 = scmp.lt.s32.totalorder %s2044_s10, 4 }
  0x62   : > { %s252_s16 = sand.u32 1, %s2024_s29   ;;  %s2653_s24 = smov (%p40_p5, %s2651_s24), 0 }
  0x63   : > { %s1284_s17 = sshll.u32 %s252_s16, 6  ;;  %s42_s19 = ssub.s32 %s2040_s9, %s2653_s24 }
  0x64   : > { %s44_s27 = sor.u32 %s2271_s7, %s42_s19  ;;  %p181_p13 = scmp.eq.s32.totalorder %s42_s19, 0 }
  0x65   : > { %p45_p4 = scmp.eq.s32.totalorder %s44_s27, 0  ;;  %s1354_s20 = sshll.u32 %s2040_s9, 5 }
  0x66   : > { %s2601_s3 = sadd.s32 1, %s2000_s23  ;;  %s262_s13 = sadd.s32 %s2036_s8, %s1354_s20 }
  0x67   : > { %s2291_s5 = scalar_select %p181_p13, %s2000_s23, %s2601_s3  }
  0x68   : > { %s2294_s6 = scalar_select %p45_p4, %s2024_s29, %s47_s21  }
  0x69   : > { %s256_s2 = scalar_lea.vmem [#allocation3], %s1284_s17  ;;  %s1287_s30 = sshll.u32 %s262_s13, 6 }
  0x6a   : > { %s265_s4 = sshll.u32 %s256_s2, 4  ;;  %s2302_s11 = scalar_lea.hbm %s2548_s0, %s1287_s30  ;;  %s2297_s4 = int_to_ptr.vmem [resolvable:$true] %s265_s4 }
  0x6b   : > { %p2308_p7 = pnand %p2576_p11, %p2275_p2  ;;  %s2312_s2 = scalar_lea.sflag [#allocation4], %s252_s16 }
  0x6c   : > { %s1826_s13 = scalar_lea.hbm %s2302_s11, 1024  ;;  %s1831_s30 = scalar_lea.hbm %s2548_s0, 4096 }
  0x6d   : > { %p1827_p8 = scmp.ne.s32.totalorder %s2302_s11, %s1826_s13  ;;  %p1828_p10 = pneg %p2308_p7 }
  0x6e   : > { %p1832_p6 = scmp.lt.u32.totalorder %s2302_s11, %s2548_s0  ;;  %p1833_p1 = scmp.lt.u32.totalorder %s1831_s30, %s1826_s13 }
  0x6f   : > { %p1829_p12 = pnand %p1828_p10, %p1827_p8  ;;  %p1835_p5 = scmp.lt.u32.totalorder %s1826_s13, %s2302_s11 }
  0x70   : > { %p1834_p2 = por %p1833_p1, %p1832_p6 }
  0x71   : > { %p1830_p0 = pneg %p1829_p12 }
  0x72   : > { %p1836_p13 = por %p1835_p5, %p1834_p2 }
  0x74   : > { %p1837_p4 = pnand %p1836_p13, %p1830_p0 }
  0x76   : > { %1840 = shalt.err (!%p1837_p4)
}
  0x77   : > { %s1841_s16 = scalar_lea.vmem %s2297_s4, 1024  ;;  %s2050_s19 = smov [#allocation3]  }
  0x78   : > { %p1842_p8 = scmp.ne.s32.totalorder %s2297_s4, %s1841_s16  ;;  %s1846_s27 = sshll.u32 %s2050_s19, 4  ;;  %s1847_s27 = int_to_ptr.vmem [resolvable:$false] %s1846_s27 }
  0x79   : > { %s1848_s20 = scalar_lea.vmem %s1847_s27, 2048  ;;  %p1849_p3 = scmp.lt.s32.totalorder %s2297_s4, %s1847_s27 }
  0x7a   : > { %p1844_p12 = pnand %p1842_p8, %p1828_p10  ;;  %p1850_p6 = scmp.lt.s32.totalorder %s1848_s20, %s1841_s16 }
  0x7c   : > { %p1845_p11 = pneg %p1844_p12  ;;  %p1851_p1 = por %p1850_p6, %p1849_p3 }
  0x7e   : > { %p1852_p2 = pnand %p1851_p1, %p1845_p11 }
  0x80   : > { %1855 = shalt.err (!%p1852_p2)
}
  0x81   : > { %s2051_s3 = smov 128   ;;  %s2603_s13 = smov 4  }
  0x82   : > { %s2604_s22 = smov 64   ;;  %s73_s15 = sadd.s32 1, %s2012_s26 }
  0x83   : > { %1604 = dma.hbm_to_vmem [thread:$0]  (!%p2308_p7), %s2302_s11, 1024, %s2297_s4, %s2312_s2, %s2051_s3, %s2604_s22, %s2603_s13  }
  0x84   : > { %p80_p3 = scmp.ne.s32.totalorder %s2012_s26, %s2008_s25  ;;  %p2605_p11 = scmp.eq.s32.totalorder %s2044_s10, 0 }
  0x85   : > { %s2348_s21 = scalar_select %p71_p9, %s2012_s26, %s73_s15  }
  0x86   : > { %p82_p10 = por %p80_p3, %p2605_p11  ;;  %s275_s30 = sand.u32 1, %s2044_s10  }
  0x87   : > { %s277_s12 = sand.u32 1, %s2012_s26   ;;  %s1355_s16 = sshll.u32 %s2036_s8, 10 }
  0x88   : > { %s1288_s17 = sshll.u32 %s277_s12, 6  ;;  %s2358_s20 = scalar_lea.hbm %s2549_s1, %s1355_s16 }
  0x89   : > { %s279_s4 = scalar_lea.vmem [#allocation6], %s1288_s17  ;;  %p2606_p7 = scmp.lt.s32.totalorder %s2044_s10, 4 }
  0x8a   : > { %s286_s11 = sshll.u32 %s279_s4, 4  ;;  %s2368_s2 = scalar_lea.sflag [#allocation7], %s275_s30  ;;  %s2366_s11 = int_to_ptr.vmem [resolvable:$true] %s286_s11 }
  0x8b   : > { %p2362_p9 = pnand %p2606_p7, %p82_p10  ;;  %s1856_s3 = scalar_lea.hbm %s2358_s20, 1024 }
  0x8c   : > { %p1857_p0 = scmp.ne.s32.totalorder %s2358_s20, %s1856_s3  ;;  %s1861_s17 = scalar_lea.hbm %s2549_s1, 2048 }
  0x8d   : > { %p1858_p5 = pneg %p2362_p9  ;;  %p1862_p8 = scmp.lt.u32.totalorder %s2358_s20, %s2549_s1 }
  0x8e   : > { %p1863_p12 = scmp.lt.u32.totalorder %s1861_s17, %s1856_s3  ;;  %p1865_p1 = scmp.lt.u32.totalorder %s1856_s3, %s2358_s20 }
  0x8f   : > { %p1859_p13 = pnand %p1858_p5, %p1857_p0 }
  0x90   : > { %p1864_p6 = por %p1863_p12, %p1862_p8 }
  0x91   : > { %p1860_p4 = pneg %p1859_p13 }
  0x92   : > { %p1866_p2 = por %p1865_p1, %p1864_p6 }
  0x94   : > { %p1867_p3 = pnand %p1866_p2, %p1860_p4 }
  0x96   : > { %1870 = shalt.err (!%p1867_p3)
}
  0x97   : > { %s1871_s30 = scalar_lea.vmem %s2366_s11, 1024  ;;  %s2052_s27 = smov [#allocation6]  }
  0x98   : > { %p1872_p11 = scmp.ne.s32.totalorder %s2366_s11, %s1871_s30  ;;  %s1876_s4 = sshll.u32 %s2052_s27, 4  ;;  %s1877_s4 = int_to_ptr.vmem [resolvable:$false] %s1876_s4 }
  0x99   : > { %s1878_s15 = scalar_lea.vmem %s1877_s4, 2048  ;;  %p1879_p0 = scmp.lt.s32.totalorder %s2366_s11, %s1877_s4 }
  0x9a   : > { %p1874_p10 = pnand %p1872_p11, %p1858_p5  ;;  %p1880_p13 = scmp.lt.s32.totalorder %s1878_s15, %s1871_s30 }
  0x9c   : > { %p1875_p7 = pneg %p1874_p10  ;;  %p1881_p8 = por %p1880_p13, %p1879_p0 }
  0x9e   : > { %p1882_p12 = pnand %p1881_p8, %p1875_p7 }
  0xa0   : > { %1885 = shalt.err (!%p1882_p12)
}
  0xa1   : > { %1607 = dma.hbm_to_vmem [thread:$0]  (!%p2362_p9), %s2358_s20, 1024, %s2366_s11, %s2368_s2, %s2604_s22, %s2604_s22, %s2603_s13  }
  0xa2   : > { %p2608_p5 = scmp.ne.s32.totalorder %s2595_s18, 0 }
  0xa3   : > { %s300_s3 = sand.u32 (!%p2608_p5), 1, %s2020_s28   ;;  %p2609_p4 = scmp.ne.s32.totalorder (!%p2608_p5), %s2588_s14, 0 }
  0xa4   : > { %298 = sbr.rel (%p2608_p5) target bundleno = 961 (0x3c1), region = 44  ;;  %s1292_s12 = sshll.u32 (!%p2608_p5), %s300_s3, 6 }
  0xa5   : > { %s301_s17 = scalar_lea.sflag (!%p2608_p5), [#allocation4], %s300_s3  ;;  %s2402_s16 = scalar_lea.vmem (!%p2608_p5), [#allocation3], %s1292_s12 }
  0xab   : > { %1971 = dma.done.wait (%p2609_p4), %s301_s17, 1024  }
  0xac   : > { %1973 = vsyncadd (%p2609_p4), %s301_s17, 4294966272  ;;  %s2610_s7 = sld [smem:[#allocation21_spill]]  ;;  %s2611_s19 = sld [smem:[#allocation22_spill]] }
  0xad   : > { %s311_s13 = sand.u32 1, %s2008_s25  }
  0xae   : > { %s1293_s22 = sshll.u32 %s311_s13, 6 }
  0xaf   : > { %s2410_s20 = scalar_lea.vmem [#allocation6], %s1293_s22 }
  0xb2   : > { %s309_s30 = sand.u32 1, %s2610_s7   ;;  %p2612_p9 = scmp.ne.s32.totalorder %s2611_s19, 0 }
  0xb3   : > { %s310_s18 = scalar_lea.sflag [#allocation7], %s309_s30 }
  0xb4   : > { %1975 = dma.done.wait (%p2612_p9), %s310_s18, 1024  }
  0xb5   : > { %1977 = vsyncadd (%p2612_p9), %s310_s18, 4294966272  ;;  %p2613_p6 = scmp.eq.s32.totalorder %s2610_s7, 0 }
  0xb7   : > { %1979 = dma.done.wait (%p2613_p6), [#allocation7], 1024   ;;  %p2614_p1 = pmov %p2613_p6 }
  0xb9   : > { %1981 = vsyncadd (%p2614_p1), [#allocation7], 4294966272  ;;  %p2615_p2 = pmov %p2614_p1 }
  0xba   : > { %p2616_p3 = pmov %p2614_p1 }
  0xbb   : > { %1983 = dma.done.wait (%p2615_p2), [#allocation10], 1024  }
  0xbc   : > { %1985 = vsyncadd (%p2616_p3), [#allocation10], 4294966272  ;;  %s2617_s14 = sld [smem:[#allocation18_spill]]  ;;  %s2618_s4 = sld [smem:[#allocation19_spill]] }
  0xc2   : > { %s352_s11 = sand.u32 1, %s2617_s14   ;;  %p1297_p11 = scmp.ne.s32.totalorder %s2618_s4, 0 }
  0xc3   : > { %s1296_s2 = sshll.u32 %s352_s11, 6  ;;  %v2053_v0 = vmov (!%p1297_p11), 0.0  }
  0xc4   : > { %s2427_s27 = scalar_lea.vmem [#allocation11], %s1296_s2  ;;  %362 = sbr.rel (%p1297_p11) target bundleno = 204 (0xcc), region = 64  ;;  %363 = vst [vmem:[#allocation2] sm:$0xff] (!%p1297_p11), %v2053_v0  ;;  %364 = vst [vmem:[#allocation2 + $0x8] sm:$0xff] (!%p1297_p11), %v2053_v0 }
  0xc5   : > { %365 = vst [vmem:[#allocation2 + $0x10] sm:$0xff] (!%p1297_p11), %v2053_v0  ;;  %366 = vst [vmem:[#allocation2 + $0x18] sm:$0xff] (!%p1297_p11), %v2053_v0 }
  0xc6   : > { %367 = vst [vmem:[#allocation2 + $0x20] sm:$0xff] (!%p1297_p11), %v2053_v0  ;;  %368 = vst [vmem:[#allocation2 + $0x28] sm:$0xff] (!%p1297_p11), %v2053_v0 }
  0xc7   : > { %369 = vst [vmem:[#allocation2 + $0x30] sm:$0xff] (!%p1297_p11), %v2053_v0  ;;  %370 = vst [vmem:[#allocation2 + $0x38] sm:$0xff] (!%p1297_p11), %v2053_v0 }
  0xc8   : > { %371 = vst [vmem:[#allocation2 + $0x40] sm:$0xff] (!%p1297_p11), %v2053_v0  ;;  %372 = vst [vmem:[#allocation2 + $0x48] sm:$0xff] (!%p1297_p11), %v2053_v0 }
  0xc9   : > { %373 = vst [vmem:[#allocation2 + $0x50] sm:$0xff] (!%p1297_p11), %v2053_v0  ;;  %374 = vst [vmem:[#allocation2 + $0x58] sm:$0xff] (!%p1297_p11), %v2053_v0 }
  0xca   : > { %375 = vst [vmem:[#allocation2 + $0x60] sm:$0xff] (!%p1297_p11), %v2053_v0  ;;  %376 = vst [vmem:[#allocation2 + $0x68] sm:$0xff] (!%p1297_p11), %v2053_v0 }
  0xcb   : > { %377 = vst [vmem:[#allocation2 + $0x70] sm:$0xff] %v2053_v0  ;;  %378 = vst [vmem:[#allocation2 + $0x78] sm:$0xff] %v2053_v0 }
  0xcc PF: > { %v1738_v1 = vld [vmem:[%s2410_s20] sm:$0xff]   ;;  %v1739_v2 = vld [vmem:[%s2410_s20 + $0x8] sm:$0xff]   ;;  %v1740_v3 = vld [vmem:[%s2410_s20 + $0x10] sm:$0xff]   ;;  %s2619_s15 = sld [smem:[#allocation19_spill]] }
  0xcd   : > { %1468 = vmatprep.subr.bf16.mxu0 %v1738_v1  ;;  %1564 = vmatprep.subr.bf16.mxu1 %v1738_v1  ;;  %v1741_v4 = vld [vmem:[%s2410_s20 + $0x18] sm:$0xff]   ;;  %v1746_v5 = vld [vmem:[%s2402_s16] sm:$0xff]   ;;  %v1743_v8 = vld [vmem:[%s2410_s20 + $0x28] sm:$0xff]  }
  0xce   : > { %1469 = vmatpush3.bf16.msra.mxu0 %v1738_v1  ;;  %1572 = vmatpush3.bf16.msra.mxu1 %v1738_v1  ;;  %v1747_v6 = vld [vmem:[%s2402_s16 + $0x20] sm:$0xff]   ;;  %v1744_v9 = vld [vmem:[%s2410_s20 + $0x30] sm:$0xff]   ;;  %v1745_v10 = vld [vmem:[%s2410_s20 + $0x38] sm:$0xff]  }
  0xcf   : > { %1470 = vmatprep.subr.bf16.mxu0 %v1739_v2  ;;  %1565 = vmatprep.subr.bf16.mxu1 %v1739_v2  ;;  %v1742_v7 = vld [vmem:[%s2410_s20 + $0x20] sm:$0xff]   ;;  %v1748_v11 = vld [vmem:[%s2402_s16 + $0x8] sm:$0xff]   ;;  %v1750_v13 = vld [vmem:[%s2402_s16 + $0x10] sm:$0xff]  }
  0xd0   : > { %1484 = vmatprep.mubr.bf16.mxu0 %v1746_v5  ;;  %1492 = vmatprep.mubr.bf16.mxu1 %v1747_v6  ;;  %v1749_v12 = vld [vmem:[%s2402_s16 + $0x28] sm:$0xff]   ;;  %v1751_v14 = vld [vmem:[%s2402_s16 + $0x30] sm:$0xff]   ;;  %v1752_v15 = vld [vmem:[%s2402_s16 + $0x18] sm:$0xff]  }
  0xd1   : > { %v1753_v16 = vld [vmem:[%s2402_s16 + $0x38] sm:$0xff]   ;;  %v381_v17 = vld [vmem:[#allocation2 + $0x10] sm:$0xff]  ;;  %v379_v19 = vld [vmem:[#allocation2] sm:$0xff] }
  0xd2   : > { %1471 = vmatpush3.bf16.msra.mxu0 %v1739_v2  ;;  %1573 = vmatpush3.bf16.msra.mxu1 %v1739_v2  ;;  %v389_v18 = vld [vmem:[#allocation2 + $0x50] sm:$0xff]  ;;  %v387_v20 = vld [vmem:[#allocation2 + $0x40] sm:$0xff]  ;;  %v382_v23 = vld [vmem:[#allocation2 + $0x18] sm:$0xff]  ;;  %p1314_p10 = scmp.ne.s32.totalorder %s2619_s15, 1 }
  0xd3   : > { %1472 = vmatprep.subr.bf16.mxu0 %v1740_v3  ;;  %1566 = vmatprep.subr.bf16.mxu1 %v1740_v3  ;;  %v390_v24 = vld [vmem:[#allocation2 + $0x58] sm:$0xff]  ;;  %v380_v29 = vld [vmem:[#allocation2 + $0x8] sm:$0xff]  ;;  %v385_v41 = vld [vmem:[#allocation2 + $0x30] sm:$0xff]  ;;  %s2620_s17 = sld [smem:[#allocation27_spill]] (!%p1314_p10)  ;;  %s2621_s19 = sld [smem:[#allocation29_spill]] (!%p1314_p10) }
  0xd4   : > { %v388_v30 = vld [vmem:[#allocation2 + $0x48] sm:$0xff]  ;;  %v393_v42 = vld [vmem:[#allocation2 + $0x70] sm:$0xff]  ;;  %v383_v43 = vld [vmem:[#allocation2 + $0x20] sm:$0xff] }
  0xd5   : > { %v391_v44 = vld [vmem:[#allocation2 + $0x60] sm:$0xff]  ;;  %v386_v47 = vld [vmem:[#allocation2 + $0x38] sm:$0xff]  ;;  %v384_v53 = vld [vmem:[#allocation2 + $0x28] sm:$0xff] }
  0xd6   : > { %1473 = vmatpush3.bf16.msra.mxu0 %v1740_v3  ;;  %1574 = vmatpush3.bf16.msra.mxu1 %v1740_v3  ;;  %v394_v48 = vld [vmem:[#allocation2 + $0x78] sm:$0xff]  ;;  %v392_v54 = vld [vmem:[#allocation2 + $0x68] sm:$0xff]  ;;  %v1754_v1 = vld [vmem:[#allocation8] sm:$0xff] (!%p1314_p10)  }
  0xd7   : > { %1474 = vmatprep.subr.bf16.mxu0 %v1741_v4  ;;  %1567 = vmatprep.subr.bf16.mxu1 %v1741_v4  ;;  %v1755_v2 = vld [vmem:[#allocation8 + $0x8] sm:$0xff] (!%p1314_p10)   ;;  %v1756_v3 = vld [vmem:[#allocation8 + $0x10] sm:$0xff] (!%p1314_p10)  }
  0xda   : > { %1475 = vmatpush3.bf16.msra.mxu0 %v1741_v4  ;;  %1575 = vmatpush3.bf16.msra.mxu1 %v1741_v4  ;;  %v1757_v4 = vld [vmem:[#allocation8 + $0x18] sm:$0xff] (!%p1314_p10)  }
  0xdb   : > { %1476 = vmatprep.subr.bf16.mxu0 %v1742_v7  ;;  %1568 = vmatprep.subr.bf16.mxu1 %v1742_v7 }
  0xde   : > { %1477 = vmatpush3.bf16.msra.mxu0 %v1742_v7  ;;  %1576 = vmatpush3.bf16.msra.mxu1 %v1742_v7 }
  0xdf   : > { %1478 = vmatprep.subr.bf16.mxu0 %v1743_v8  ;;  %1569 = vmatprep.subr.bf16.mxu1 %v1743_v8 }
  0xe2   : > { %1479 = vmatpush3.bf16.msra.mxu0 %v1743_v8  ;;  %1577 = vmatpush3.bf16.msra.mxu1 %v1743_v8  ;;  %v1758_v8 = vld [vmem:[#allocation8 + $0x20] sm:$0xff] (!%p1314_p10)  }
  0xe3   : > { %1480 = vmatprep.subr.bf16.mxu0 %v1744_v9  ;;  %1570 = vmatprep.subr.bf16.mxu1 %v1744_v9 }
  0xe6   : > { %1481 = vmatpush3.bf16.msra.mxu0 %v1744_v9  ;;  %1578 = vmatpush3.bf16.msra.mxu1 %v1744_v9  ;;  %v1762_v9 = vld [vmem:[#allocation9] sm:$0xff] (!%p1314_p10)  }
  0xe7   : > { %1482 = vmatprep.subr.bf16.mxu0 %v1745_v10  ;;  %1571 = vmatprep.subr.bf16.mxu1 %v1745_v10 }
  0xea   : > { %1483 = vmatpush3.bf16.msra.mxu0 %v1745_v10  ;;  %1579 = vmatpush3.bf16.msra.mxu1 %v1745_v10  ;;  %v1763_v10 = vld [vmem:[#allocation9 + $0x8] sm:$0xff] (!%p1314_p10)  }
  0xeb   : > { %1500 = vmatprep.subr.bf16.mxu0 (!%p1314_p10), %v1754_v1  ;;  %1532 = vmatprep.subr.bf16.mxu1 (!%p1314_p10), %v1762_v9 }
  0xed   : > { %1485 = vmatmul.mubr.bf16.vlgmr.msra.gmra.mrb[0].mxu0 %v1748_v11  ;;  %1493 = vmatmul.mubr.bf16.vlgmr.msra.gmra.mrb[0].mxu1 %v1749_v12  ;;  %v1759_v11 = vld [vmem:[#allocation8 + $0x28] sm:$0xff] (!%p1314_p10)   ;;  %v1764_v12 = vld [vmem:[#allocation9 + $0x10] sm:$0xff] (!%p1314_p10)  }
  0xee   : > { %1488 = vmatprep.mubr.bf16.mxu0 %v1750_v13  ;;  %1496 = vmatprep.mubr.bf16.mxu1 %v1751_v14  ;;  %v1760_v13 = vld [vmem:[#allocation8 + $0x30] sm:$0xff] (!%p1314_p10)   ;;  %v1765_v14 = vld [vmem:[#allocation9 + $0x18] sm:$0xff] (!%p1314_p10)  }
  0xef   : > { %1501 = vmatpush3.bf16.msra.mxu0 (!%p1314_p10), %v1754_v1  ;;  %1533 = vmatpush3.bf16.msra.mxu1 (!%p1314_p10), %v1762_v9 }
  0xf0   : > { %1502 = vmatprep.subr.bf16.mxu0 (!%p1314_p10), %v1755_v2  ;;  %1534 = vmatprep.subr.bf16.mxu1 (!%p1314_p10), %v1763_v10 }
  0xf3   : > { %1503 = vmatpush3.bf16.msra.mxu0 (!%p1314_p10), %v1755_v2  ;;  %1535 = vmatpush3.bf16.msra.mxu1 (!%p1314_p10), %v1763_v10 }
  0xf4   : > { %1504 = vmatprep.subr.bf16.mxu0 (!%p1314_p10), %v1756_v3  ;;  %1536 = vmatprep.subr.bf16.mxu1 (!%p1314_p10), %v1764_v12 }
  0xf5   : > { %1489 = vmatmul.mubr.bf16.gmra.mrb[4].mxu0 %v1752_v15  ;;  %1497 = vmatmul.mubr.bf16.gmra.mrb[4].mxu1 %v1753_v16  ;;  %v1761_v15 = vld [vmem:[#allocation8 + $0x38] sm:$0xff] (!%p1314_p10)   ;;  %v1766_v16 = vld [vmem:[#allocation9 + $0x20] sm:$0xff] (!%p1314_p10)  }
  0xf7   : > { %1505 = vmatpush3.bf16.msra.mxu0 (!%p1314_p10), %v1756_v3  ;;  %1537 = vmatpush3.bf16.msra.mxu1 (!%p1314_p10), %v1764_v12 }
  0xf8   : > { %1506 = vmatprep.subr.bf16.mxu0 (!%p1314_p10), %v1757_v4  ;;  %1538 = vmatprep.subr.bf16.mxu1 (!%p1314_p10), %v1765_v14 }
  0xfb   : > { %1507 = vmatpush3.bf16.msra.mxu0 (!%p1314_p10), %v1757_v4  ;;  %1539 = vmatpush3.bf16.msra.mxu1 (!%p1314_p10), %v1765_v14 }
  0xfc   : > { %1508 = vmatprep.subr.bf16.mxu0 (!%p1314_p10), %v1758_v8  ;;  %1540 = vmatprep.subr.bf16.mxu1 (!%p1314_p10), %v1766_v16 }
  0xff   : > { %1509 = vmatpush3.bf16.msra.mxu0 (!%p1314_p10), %v1758_v8  ;;  %1541 = vmatpush3.bf16.msra.mxu1 (!%p1314_p10), %v1766_v16 }
 0x100   : > { %1510 = vmatprep.subr.bf16.mxu0 (!%p1314_p10), %v1759_v11 }
 0x103   : > { %1511 = vmatpush3.bf16.msra.mxu0 (!%p1314_p10), %v1759_v11 }
 0x104   : > { %1512 = vmatprep.subr.bf16.mxu0 (!%p1314_p10), %v1760_v13 }
 0x107   : > { %1513 = vmatpush3.bf16.msra.mxu0 (!%p1314_p10), %v1760_v13 }
 0x108   : > { %1514 = vmatprep.subr.bf16.mxu0 (!%p1314_p10), %v1761_v15 }
 0x10b   : > { %1515 = vmatpush3.bf16.msra.mxu0 (!%p1314_p10), %v1761_v15 }
 0x1c0   : > { %v1486_v21 = vpop.f32.mrb[0].mxu0  ;;  %v1494_v22 = vpop.f32.mrb[0].mxu1 }
 0x1c1   : > { %v622_v25 = vadd.f32 %v1486_v21, %v381_v17  ;;  %v630_v26 = vadd.f32 %v1494_v22, %v389_v18  ;;  %v557_v27 = vpop.f32.mrb[1].mxu0  ;;  %v589_v28 = vpop.f32.mrb[1].mxu1  ;;  %v1767_v22 = vld [vmem:[#allocation9 + $0x28] sm:$0xff] (!%p1314_p10)  }
 0x1c2   : > { %v620_v31 = vadd.f32 %v557_v27, %v379_v19  ;;  %v628_v32 = vadd.f32 %v589_v28, %v387_v20  ;;  %v1487_v33 = vpop.f32.mrb[2].mxu0  ;;  %v1495_v34 = vpop.f32.mrb[2].mxu1  ;;  %1542 = vmatprep.subr.bf16.mxu1 (!%p1314_p10), %v1767_v22 }
 0x1c3   : > { %638 = vst [vmem:[#allocation2 + $0x10] sm:$0xff] %v622_v25  ;;  %646 = vst [vmem:[#allocation2 + $0x50] sm:$0xff] %v630_v26  ;;  %v623_v35 = vadd.f32 %v1487_v33, %v382_v23  ;;  %v631_v36 = vadd.f32 %v1495_v34, %v390_v24  ;;  %v560_v37 = vpop.f32.mrb[3].mxu0  ;;  %v592_v38 = vpop.f32.mrb[3].mxu1  ;;  %1543 = vmatpush3.bf16.msra.mxu1 (!%p1314_p10), %v1767_v22 }
 0x1c4   : > { %636 = vst [vmem:[#allocation2] sm:$0xff] %v620_v31  ;;  %644 = vst [vmem:[#allocation2 + $0x40] sm:$0xff] %v628_v32  ;;  %v621_v39 = vadd.f32 %v560_v37, %v380_v29  ;;  %v629_v40 = vadd.f32 %v592_v38, %v388_v30 }
 0x1c5   : > { %639 = vst [vmem:[#allocation2 + $0x18] sm:$0xff] %v623_v35  ;;  %647 = vst [vmem:[#allocation2 + $0x58] sm:$0xff] %v631_v36 }
 0x1c6   : > { %637 = vst [vmem:[#allocation2 + $0x8] sm:$0xff] %v621_v39  ;;  %645 = vst [vmem:[#allocation2 + $0x48] sm:$0xff] %v629_v40  ;;  %v1768_v39 = vld [vmem:[#allocation9 + $0x30] sm:$0xff] (!%p1314_p10)   ;;  %v1769_v40 = vld [vmem:[#allocation9 + $0x38] sm:$0xff] (!%p1314_p10)  }
 0x1c7   : > { %1544 = vmatprep.subr.bf16.mxu1 (!%p1314_p10), %v1768_v39 }
 0x1c8   : > { %v1490_v45 = vpop.f32.mrb[4].mxu0  ;;  %v1498_v46 = vpop.f32.mrb[4].mxu1  ;;  %655 = sbr.rel (%p1314_p10) target bundleno = 933 (0x3a5), region = 68  ;;  %1545 = vmatpush3.bf16.msra.mxu1 (!%p1314_p10), %v1768_v39 }
 0x1c9   : > { %v626_v49 = vadd.f32 %v1490_v45, %v385_v41  ;;  %v634_v50 = vadd.f32 %v1498_v46, %v393_v42  ;;  %v573_v51 = vpop.f32.mrb[5].mxu0  ;;  %v605_v52 = vpop.f32.mrb[5].mxu1  ;;  %1546 = vmatprep.subr.bf16.mxu1 (!%p1314_p10), %v1769_v40  ;;  %v1315_v41 = vld [vmem:[%s2620_s17] ss:$0 sm:$0xff] (!%p1314_p10) }
 0x1ca   : > { %v624_v55 = vadd.f32 %v573_v51, %v383_v43  ;;  %v632_v56 = vadd.f32 %v605_v52, %v391_v44  ;;  %v1491_v57 = vpop.f32.mrb[6].mxu0  ;;  %v1499_v58 = vpop.f32.mrb[6].mxu1  ;;  %v658_v17 = vld [vmem:[#allocation2 + $0x10] sm:$0xff] (!%p1314_p10) }
 0x1cb   : > { %642 = vst [vmem:[#allocation2 + $0x30] sm:$0xff] %v626_v49  ;;  %650 = vst [vmem:[#allocation2 + $0x70] sm:$0xff] %v634_v50  ;;  %v627_v59 = vadd.f32 %v1491_v57, %v386_v47  ;;  %v635_v60 = vadd.f32 %v1499_v58, %v394_v48  ;;  %v576_v61 = vpop.f32.mrb[7].mxu0  ;;  %v608_v62 = vpop.f32.mrb[7].mxu1  ;;  %v656_v5 = vld [vmem:[#allocation2] sm:$0xff] (!%p1314_p10)  ;;  %v666_v30 = vld [vmem:[#allocation2 + $0x50] sm:$0xff] (!%p1314_p10) }
 0x1cc   : > { %640 = vst [vmem:[#allocation2 + $0x20] sm:$0xff] %v624_v55  ;;  %648 = vst [vmem:[#allocation2 + $0x60] sm:$0xff] %v632_v56  ;;  %v625_v63 = vadd.f32 %v576_v61, %v384_v53  ;;  %v633_v0 = vadd.f32 %v608_v62, %v392_v54  ;;  %v659_v18 = vld [vmem:[#allocation2 + $0x18] sm:$0xff] (!%p1314_p10)  ;;  %v664_v26 = vld [vmem:[#allocation2 + $0x40] sm:$0xff] (!%p1314_p10)  ;;  %1547 = vmatpush3.bf16.msra.mxu1 (!%p1314_p10), %v1769_v40 }
 0x1cd   : > { %643 = vst [vmem:[#allocation2 + $0x38] sm:$0xff] %v627_v59  ;;  %651 = vst [vmem:[#allocation2 + $0x78] sm:$0xff] %v635_v60  ;;  %v657_v6 = vld [vmem:[#allocation2 + $0x8] sm:$0xff] (!%p1314_p10)  ;;  %v673_v21 = vpack.c.bf16 (!%p1314_p10), %v659_v18, %v658_v17  ;;  %v667_v31 = vld [vmem:[#allocation2 + $0x58] sm:$0xff] (!%p1314_p10) }
 0x1ce   : > { %641 = vst [vmem:[#allocation2 + $0x28] sm:$0xff] %v625_v63  ;;  %649 = vst [vmem:[#allocation2 + $0x68] sm:$0xff] %v633_v0  ;;  %v672_v7 = vpack.c.bf16 (!%p1314_p10), %v657_v6, %v656_v5  ;;  %v665_v27 = vld [vmem:[#allocation2 + $0x48] sm:$0xff] (!%p1314_p10)  ;;  %v677_v34 = vpack.c.bf16 (!%p1314_p10), %v667_v31, %v666_v30 }
 0x1cf   : > { %v676_v29 = vpack.c.bf16 %v665_v27, %v664_v26 }
 0x1d0   : > { %1516 = vmatprep.mubr.bf16.mxu0 %v672_v7 }
 0x1d1   : > { %1517 = vmatmul.mubr.bf16.vlgmr.msra.gmra.mrb[0].mxu0 %v673_v21 }
 0x1d2   : > { %v662_v24 = vld [vmem:[#allocation2 + $0x30] sm:$0xff] }
 0x1d3   : > { %v660_v19 = vld [vmem:[#allocation2 + $0x20] sm:$0xff]  ;;  %v670_v36 = vld [vmem:[#allocation2 + $0x70] sm:$0xff] }
 0x1d4   : > { %v663_v25 = vld [vmem:[#allocation2 + $0x38] sm:$0xff]  ;;  %v668_v32 = vld [vmem:[#allocation2 + $0x60] sm:$0xff] }
 0x1d5   : > { %v661_v20 = vld [vmem:[#allocation2 + $0x28] sm:$0xff]  ;;  %v675_v28 = vpack.c.bf16 %v663_v25, %v662_v24  ;;  %v671_v37 = vld [vmem:[#allocation2 + $0x78] sm:$0xff] }
 0x1d6   : > { %v674_v23 = vpack.c.bf16 %v661_v20, %v660_v19  ;;  %v669_v33 = vld [vmem:[#allocation2 + $0x68] sm:$0xff]  ;;  %v679_v38 = vpack.c.bf16 %v671_v37, %v670_v36 }
 0x1d7   : > { %v678_v35 = vpack.c.bf16 %v669_v33, %v668_v32 }
 0x1d8   : > { %1520 = vmatprep.mubr.bf16.mxu0 %v674_v23 }
 0x1d9   : > { %1521 = vmatmul.mubr.bf16.gmra.mrb[4].mxu0 %v675_v28 }
 0x1da   : > { %1524 = vmatprep.mubr.bf16.mxu0 %v676_v29 }
 0x1e1   : > { %1525 = vmatmul.mubr.bf16.gmra.mrb[8].mxu0 %v677_v34  ;;  %v1324_v34 = vld [vmem:[%s2621_s19] ss:$0 sm:$0xff] }
 0x1e2   : > { %1528 = vmatprep.mubr.bf16.mxu0 %v678_v35 }
 0x1e9   : > { %1529 = vmatmul.mubr.bf16.gmra.mrb[12].mxu0 %v679_v38 }
 0x2a4   : > { %v1518_v42 = vpop.f32.mrb[0].mxu0 }
 0x2a5   : > { %v794_v43 = vadd.f32 %v1518_v42, %v1315_v41  ;;  %v785_v44 = vpop.f32.mrb[1].mxu0 }
 0x2a6   : > { %v786_v45 = vadd.f32 %v1315_v41, %v785_v44  ;;  %v1519_v46 = vpop.f32.mrb[2].mxu0 }
 0x2a7   : > { %v797_v47 = vadd.f32 %v1519_v46, %v1315_v41  ;;  %v788_v48 = vpop.f32.mrb[3].mxu0  ;;  %v850_v50 = vmax.f32 %v794_v43, 0.0 }
 0x2a8   : > { %v789_v49 = vadd.f32 %v1315_v41, %v788_v48  ;;  %v848_v52 = vmax.f32 %v786_v45, 0.0 }
 0x2a9   : > { %v851_v51 = vmax.f32 %v797_v47, 0.0 }
 0x2aa   : > { %v849_v53 = vmax.f32 %v789_v49, 0.0 }
 0x2ab   : > { %v865_v54 = vpack.c.bf16 %v851_v51, %v850_v50 }
 0x2ac   : > { %v1522_v55 = vpop.f32.mrb[4].mxu0  ;;  %v864_v56 = vpack.c.bf16 %v849_v53, %v848_v52 }
 0x2ad   : > { %v810_v57 = vadd.f32 %v1522_v55, %v1315_v41  ;;  %v801_v58 = vpop.f32.mrb[5].mxu0 }
 0x2ae   : > { %v802_v59 = vadd.f32 %v1315_v41, %v801_v58  ;;  %v1523_v60 = vpop.f32.mrb[6].mxu0  ;;  %1548 = vmatprep.mubr.bf16.mxu1 %v864_v56 }
 0x2af   : > { %v813_v61 = vadd.f32 %v1523_v60, %v1315_v41  ;;  %v804_v62 = vpop.f32.mrb[7].mxu0  ;;  %1549 = vmatmul.mubr.bf16.vlgmr.msra.gmra.mrb[0].mxu1 %v865_v54  ;;  %v854_v0 = vmax.f32 %v810_v57, 0.0 }
 0x2b0   : > { %v805_v63 = vadd.f32 %v1315_v41, %v804_v62  ;;  %v852_v2 = vmax.f32 %v802_v59, 0.0 }
 0x2b1   : > { %v855_v1 = vmax.f32 %v813_v61, 0.0 }
 0x2b2   : > { %v853_v3 = vmax.f32 %v805_v63, 0.0 }
 0x2b3   : > { %v867_v4 = vpack.c.bf16 %v855_v1, %v854_v0 }
 0x2b4   : > { %v866_v5 = vpack.c.bf16 %v853_v3, %v852_v2  ;;  %v1526_v6 = vpop.f32.mrb[8].mxu0 }
 0x2b5   : > { %v826_v7 = vadd.f32 %v1526_v6, %v1315_v41  ;;  %v817_v8 = vpop.f32.mrb[9].mxu0 }
 0x2b6   : > { %v818_v9 = vadd.f32 %v1315_v41, %v817_v8  ;;  %v1527_v10 = vpop.f32.mrb[10].mxu0  ;;  %1552 = vmatprep.mubr.bf16.mxu1 %v866_v5 }
 0x2b7   : > { %v829_v11 = vadd.f32 %v1527_v10, %v1315_v41  ;;  %v820_v12 = vpop.f32.mrb[11].mxu0  ;;  %1553 = vmatmul.mubr.bf16.gmra.mrb[4].mxu1 %v867_v4  ;;  %v858_v14 = vmax.f32 %v826_v7, 0.0 }
 0x2b8   : > { %v821_v13 = vadd.f32 %v1315_v41, %v820_v12  ;;  %v856_v16 = vmax.f32 %v818_v9, 0.0 }
 0x2b9   : > { %v859_v15 = vmax.f32 %v829_v11, 0.0 }
 0x2ba   : > { %v857_v17 = vmax.f32 %v821_v13, 0.0 }
 0x2bb   : > { %v869_v18 = vpack.c.bf16 %v859_v15, %v858_v14 }
 0x2bc   : > { %v868_v19 = vpack.c.bf16 %v857_v17, %v856_v16  ;;  %v1530_v20 = vpop.f32.mrb[12].mxu0 }
 0x2bd   : > { %v842_v21 = vadd.f32 %v1530_v20, %v1315_v41  ;;  %v833_v22 = vpop.f32.mrb[13].mxu0 }
 0x2be   : > { %v834_v23 = vadd.f32 %v1315_v41, %v833_v22  ;;  %v1531_v24 = vpop.f32.mrb[14].mxu0  ;;  %1556 = vmatprep.mubr.bf16.mxu1 %v868_v19 }
 0x2bf   : > { %v845_v25 = vadd.f32 %v1531_v24, %v1315_v41  ;;  %v836_v26 = vpop.f32.mrb[15].mxu0  ;;  %1557 = vmatmul.mubr.bf16.gmra.mrb[8].mxu1 %v869_v18  ;;  %v862_v28 = vmax.f32 %v842_v21, 0.0 }
 0x2c0   : > { %v837_v27 = vadd.f32 %v1315_v41, %v836_v26  ;;  %v860_v30 = vmax.f32 %v834_v23, 0.0 }
 0x2c1   : > { %v863_v29 = vmax.f32 %v845_v25, 0.0 }
 0x2c2   : > { %v861_v31 = vmax.f32 %v837_v27, 0.0 }
 0x2c3   : > { %v871_v32 = vpack.c.bf16 %v863_v29, %v862_v28 }
 0x2c4   : > { %v870_v33 = vpack.c.bf16 %v861_v31, %v860_v30 }
 0x2c6   : > { %1560 = vmatprep.mubr.bf16.mxu1 %v870_v33 }
 0x2c7   : > { %1561 = vmatmul.mubr.bf16.gmra.mrb[12].mxu1 %v871_v32 }
 0x382   : > { %v1550_v35 = vpop.f32.mrb[0].mxu1 }
 0x383   : > { %v986_v36 = vadd.f32 %v1550_v35, %v1324_v34  ;;  %v977_v37 = vpop.f32.mrb[1].mxu1 }
 0x384   : > { %v978_v38 = vadd.f32 %v1324_v34, %v977_v37  ;;  %v1551_v39 = vpop.f32.mrb[2].mxu1 }
 0x385   : > { %v989_v40 = vadd.f32 %v1551_v39, %v1324_v34  ;;  %v980_v41 = vpop.f32.mrb[3].mxu1  ;;  %v1042_v43 = vmax.f32 %v986_v36, 0.0 }
 0x386   : > { %v981_v42 = vadd.f32 %v1324_v34, %v980_v41  ;;  %v1040_v45 = vmax.f32 %v978_v38, 0.0 }
 0x387   : > { %v1043_v44 = vmax.f32 %v989_v40, 0.0 }
 0x388   : > { %v1041_v46 = vmax.f32 %v981_v42, 0.0 }
 0x389   : > { %v1381_v47 = vpack.c.bf16 %v1043_v44, %v1042_v43 }
 0x38a   : > { %v1376_v48 = vpack.c.bf16 %v1041_v46, %v1040_v45  ;;  %v1554_v49 = vpop.f32.mrb[4].mxu1 }
 0x38b   : > { %1413 = vst [vmem:[%s2427_s27 + $0x8] sm:$0xff] %v1381_v47   ;;  %v1002_v50 = vadd.f32 %v1554_v49, %v1324_v34  ;;  %v993_v51 = vpop.f32.mrb[5].mxu1 }
 0x38c   : > { %1377 = vst [vmem:[%s2427_s27] sm:$0xff] %v1376_v48   ;;  %v994_v52 = vadd.f32 %v1324_v34, %v993_v51  ;;  %v1555_v53 = vpop.f32.mrb[6].mxu1 }
 0x38d   : > { %v1005_v54 = vadd.f32 %v1555_v53, %v1324_v34  ;;  %v996_v55 = vpop.f32.mrb[7].mxu1  ;;  %v1046_v57 = vmax.f32 %v1002_v50, 0.0 }
 0x38e   : > { %v997_v56 = vadd.f32 %v1324_v34, %v996_v55  ;;  %v1044_v59 = vmax.f32 %v994_v52, 0.0 }
 0x38f   : > { %v1047_v58 = vmax.f32 %v1005_v54, 0.0 }
 0x390   : > { %v1045_v60 = vmax.f32 %v997_v56, 0.0 }
 0x391   : > { %v1391_v61 = vpack.c.bf16 %v1047_v58, %v1046_v57 }
 0x392   : > { %v1386_v62 = vpack.c.bf16 %v1045_v60, %v1044_v59  ;;  %v1558_v63 = vpop.f32.mrb[8].mxu1 }
 0x393   : > { %1415 = vst [vmem:[%s2427_s27 + $0x18] sm:$0xff] %v1391_v61   ;;  %v1018_v0 = vadd.f32 %v1558_v63, %v1324_v34  ;;  %v1009_v1 = vpop.f32.mrb[9].mxu1 }
 0x394   : > { %1414 = vst [vmem:[%s2427_s27 + $0x10] sm:$0xff] %v1386_v62   ;;  %v1010_v2 = vadd.f32 %v1324_v34, %v1009_v1  ;;  %v1559_v3 = vpop.f32.mrb[10].mxu1 }
 0x395   : > { %v1021_v4 = vadd.f32 %v1559_v3, %v1324_v34  ;;  %v1012_v5 = vpop.f32.mrb[11].mxu1  ;;  %v1050_v7 = vmax.f32 %v1018_v0, 0.0 }
 0x396   : > { %v1013_v6 = vadd.f32 %v1324_v34, %v1012_v5  ;;  %v1048_v9 = vmax.f32 %v1010_v2, 0.0 }
 0x397   : > { %v1051_v8 = vmax.f32 %v1021_v4, 0.0 }
 0x398   : > { %v1049_v10 = vmax.f32 %v1013_v6, 0.0 }
 0x399   : > { %v1401_v11 = vpack.c.bf16 %v1051_v8, %v1050_v7 }
 0x39a   : > { %v1396_v12 = vpack.c.bf16 %v1049_v10, %v1048_v9  ;;  %v1562_v13 = vpop.f32.mrb[12].mxu1 }
 0x39b   : > { %1417 = vst [vmem:[%s2427_s27 + $0x28] sm:$0xff] %v1401_v11   ;;  %v1034_v14 = vadd.f32 %v1562_v13, %v1324_v34  ;;  %v1025_v15 = vpop.f32.mrb[13].mxu1 }
 0x39c   : > { %1416 = vst [vmem:[%s2427_s27 + $0x20] sm:$0xff] %v1396_v12   ;;  %v1026_v16 = vadd.f32 %v1324_v34, %v1025_v15  ;;  %v1563_v17 = vpop.f32.mrb[14].mxu1 }
 0x39d   : > { %v1037_v18 = vadd.f32 %v1563_v17, %v1324_v34  ;;  %v1028_v19 = vpop.f32.mrb[15].mxu1  ;;  %v1054_v21 = vmax.f32 %v1034_v14, 0.0 }
 0x39e   : > { %v1029_v20 = vadd.f32 %v1324_v34, %v1028_v19  ;;  %v1052_v23 = vmax.f32 %v1026_v16, 0.0 }
 0x39f   : > { %v1055_v22 = vmax.f32 %v1037_v18, 0.0 }
 0x3a0   : > { %v1053_v24 = vmax.f32 %v1029_v20, 0.0 }
 0x3a1   : > { %v1411_v25 = vpack.c.bf16 %v1055_v22, %v1054_v21 }
 0x3a2   : > { %v1406_v26 = vpack.c.bf16 %v1053_v24, %v1052_v23 }
 0x3a3   : > { %1419 = vst [vmem:[%s2427_s27 + $0x38] sm:$0xff] %v1411_v25  }
 0x3a4   : > { %1418 = vst [vmem:[%s2427_s27 + $0x30] sm:$0xff] %v1406_v26  }
 0x3a5 PF: > { %s2622_s30 = sld [smem:[#allocation20_spill]]  ;;  %s2624_s22 = sld [smem:[#allocation23_spill]] }
 0x3a6   : > { %s2625_s2 = sld [smem:[#allocation30_spill]]  ;;  %s1150_s15 = sshll.u32 %s2427_s27, 4  ;;  %s2468_s15 = int_to_ptr.vmem [resolvable:$true] %s1150_s15 }
 0x3a7   : > { %s2472_s3 = scalar_lea.sflag [#allocation5], %s352_s11  ;;  %s1886_s12 = scalar_lea.vmem %s2468_s15, 1024 }
 0x3a8   : > { %p1887_p7 = scmp.ne.s32.totalorder %s2468_s15, %s1886_s12  ;;  %s2054_s17 = smov [#allocation11]  }
 0x3a9   : > { %s1890_s16 = sshll.u32 %s2054_s17, 4  ;;  %s1891_s16 = int_to_ptr.vmem [resolvable:$false] %s1890_s16 }
 0x3aa   : > { %s1892_s7 = scalar_lea.vmem %s1891_s16, 2048  ;;  %p1893_p12 = scmp.lt.s32.totalorder %s2468_s15, %s1891_s16 }
 0x3ab   : > { %s1372_s18 = sshll.u32 %s2622_s30, 10  ;;  %p2626_p0 = scmp.ne.s32.totalorder %s2624_s22, 0 }
 0x3ac   : > { %s2465_s4 = scalar_lea.hbm %s2625_s2, %s1372_s18  ;;  %p1894_p5 = scmp.lt.s32.totalorder %s1892_s7, %s1886_s12 }
 0x3ad   : > { %p1888_p13 = pnand %p1887_p7, %p2626_p0 }
 0x3ae   : > { %p1895_p4 = por %p1894_p5, %p1893_p12 }
 0x3af   : > { %p1889_p8 = pneg %p1888_p13 }
 0x3b1   : > { %p1896_p9 = pnand %p1895_p4, %p1889_p8 }
 0x3b3   : > { %1899 = shalt.err (!%p1896_p9)
}
 0x3b4   : > { %s1900_s11 = scalar_lea.hbm %s2465_s4, 1024  ;;  %s1904_s30 = scalar_lea.hbm %s2625_s2, 2048 }
 0x3b5   : > { %p1901_p6 = scmp.ne.s32.totalorder %s2465_s4, %s1900_s11  ;;  %p1905_p3 = scmp.lt.u32.totalorder %s2465_s4, %s2625_s2 }
 0x3b6   : > { %p1906_p11 = scmp.lt.u32.totalorder %s1904_s30, %s1900_s11  ;;  %p1908_p7 = scmp.lt.u32.totalorder %s1900_s11, %s2465_s4 }
 0x3b7   : > { %p1902_p1 = pnand %p1901_p6, %p2626_p0 }
 0x3b8   : > { %p1907_p10 = por %p1906_p11, %p1905_p3 }
 0x3b9   : > { %p1903_p2 = pneg %p1902_p1 }
 0x3ba   : > { %p1909_p13 = por %p1908_p7, %p1907_p10 }
 0x3bc   : > { %p1910_p8 = pnand %p1909_p13, %p1903_p2 }
 0x3be   : > { %1913 = shalt.err (!%p1910_p8)
}
 0x3bf   : > { %s2055_s20 = smov 64   ;;  %s2056_s14 = smov 4  }
 0x3c0   : > { %1592 = dma.vmem_to_hbm [thread:$0]  (%p2626_p0), %s2468_s15, 1024, %s2465_s4, %s2472_s3, %s2055_s20, %s2055_s20, %s2056_s14  }
 0x3c1 PF: > { %s2627_s12 = sld [smem:[#allocation17_spill]]  ;;  %s2628_s17 = sld [smem:[#allocation24_spill]] }
 0x3c2   : > { %p1617_p12 = scmp.ge.s32.totalorder %s2044_s10, 2 }
 0x3c7   : > { %s1165_s16 = sand.u32 1, %s2627_s12   ;;  %p2629_p5 = scmp.ne.s32.totalorder %s2628_s17, 0 }
 0x3c8   : > { %s1166_s7 = scalar_lea.sflag [#allocation5], %s1165_s16 }
 0x3c9   : > { %p1609_p4 = pnand %p1617_p12, %p2629_p5 }
 0x3cb   : > { %1987 = dma.done.wait (!%p1609_p4), %s1166_s7, 1024  }
 0x3cc   : > { %1989 = vsyncadd (!%p1609_p4), %s1166_s7, 4294966272  ;;  %s26_s10 = sadd.s32 1, %s2044_s10   ;;  %s2631_s27 = sld [smem:[#allocation18_spill]] }
 0x3cd   : > { %p2501_p9 = scmp.ge.s32.totalorder %s26_s10, 6   ;;  %s2632_s4 = smov %s2348_s21 }
 0x3ce   : > { %s2633_s15 = sld [smem:[#allocation25_spill]]  ;;  %s2634_s3 = smov %s2653_s24 }
 0x3cf   : > { %s2636_s22 = smov %s2000_s23  ;;  %s2637_s23 = smov %s2291_s5 }
 0x3d0   : > { %s2638_s24 = smov %s2008_s25  ;;  %s2639_s25 = smov %s2012_s26 }
 0x3d1   : > { %s2640_s26 = smov %s2632_s4  ;;  %s2644_s30 = smov %s2036_s8 }
 0x3d2   : > { %s2635_s21 = smov %s2631_s27  ;;  %s2641_s27 = smov %s2020_s28 }
 0x3d3   : > { %s2642_s28 = smov %s2024_s29  ;;  %s2643_s29 = smov %s2294_s6 }
 0x3d4   : > { %s2645_s7 = smov %s2040_s9  ;;  %s2646_s8 = smov %s2633_s15 }
 0x3d5   : > { %s2647_s9 = smov %s2634_s3  ;;  %25 = sbr.rel (!%p2501_p9) target bundleno = 19 (0x13), region = 118 }
 0x3dc   :  { %1171 = vsyncpa [#allocation4], 1 }
 0x3dd   :  { %1173 = vsyncpa [#allocation4 + $0x1], 1 }
 0x3de   :  { %1174 = vsyncpa [#allocation7], 1 }
 0x3df   :  { %1176 = vsyncpa [#allocation7 + $0x1], 1 }
 0x3e0   :  { %1177 = vsyncpa [#allocation10], 1 }
 0x3e1   :  { %1178 = vsyncpa [#allocation5], 1 }
 0x3e2   :  { %1180 = vsyncpa [#allocation5 + $0x1], 1 }

</bundles_post_ra>
